<compile_context>
chip_gen: v5e
topology: v5e:2x2
jax: 0.10.0
libtpu: 0.0.40
codegen_flags: <defaults>
</compile_context>

<pallas_src>
import functools

import jax
import jax.numpy as jnp
from jax import lax
from jax.experimental import pallas as pl
from jax.experimental.pallas import tpu as pltpu


def _translate_down_kernel(dy_ref, x_ref, o_ref, *, width, hw):
    """One block of flattened planes, shape (TP, H*W), native dtype.

    out[p, j] = x[p, j - dy*W] if j >= dy*W else 0
    (row-major flattening turns a dy-row downward shift into a dy*W lane shift).
    """
    shift = dy_ref[0] * width                       # int32 scalar from SMEM prefetch
    x = x_ref[...]                                  # native dtype (no f32 upcast)
    # XLU dynamic lane rotation; wrapped-around rows are zeroed by the mask below.
    rolled = pltpu.roll(x, shift % hw, axis=1)
    # Hoisted mask: one (1, HW) iota row, broadcast over the sublane axis.
    col = lax.broadcasted_iota(jnp.int32, (1, hw), 1)
    zero = jnp.array(0, dtype=x.dtype)
    # If dy >= H then shift >= hw and the mask is all-False -> all-zero output.
    o_ref[...] = jnp.where(col >= shift, rolled, zero)


def _choose_plane_tile(num_planes, plane_bytes, itemsize, target_bytes=8 << 20):
    """Flattened planes per grid step: ~8 MiB blocks, dtype-aware sublane quantum,
    and >=2 grid steps on non-trivial inputs (v7x megacore)."""
    quantum = max(8, 32 // max(itemsize, 1))        # 8 f32 / 16 bf16 / 32 int8
    total_bytes = num_planes * plane_bytes
    tp = max(1, target_bytes // max(plane_bytes, 1))
    if tp >= num_planes:
        # Whole plane axis would fit one block; split in two when big enough so
        # both v7x TensorCores stream HBM (grid >= 2).
        if num_planes >= 2 * quantum and total_bytes >= (2 << 20):
            tp = ((num_planes // 2) // quantum) * quantum
        else:
            return num_planes                       # tiny input: single full block
    tp = (tp // quantum) * quantum
    if tp == 0:                                     # very large planes
        tp = min(quantum, num_planes)
    return min(tp, num_planes)


def translate_down(img, dy):
    """Translate an NCHW image tensor downward by `dy` pixels (zero fill on top)."""
    N, C, H, W = img.shape
    P, HW = N * C, H * W
    x = img.reshape(P, HW)                          # lane-dense last axis
    dy_arr = jnp.asarray(dy, dtype=jnp.int32).reshape(1)

    itemsize = x.dtype.itemsize
    tp = _choose_plane_tile(P, HW * itemsize, itemsize)
    grid = (pl.cdiv(P, tp),)

    # 2x (double-buffer) x 2 (in + out) blocks plus headroom; capped at 48 MiB so
    # it stays inside v7x's 64 MiB physical VMEM, and explicit so v5e's 16 MiB
    # default scoped limit never truncates pipelining.
    block_bytes = tp * HW * itemsize
    vmem_limit = int(min(48 << 20, max(16 << 20, 4 * block_bytes + (4 << 20))))

    kernel = functools.partial(_translate_down_kernel, width=W, hw=HW)
    out = pl.pallas_call(
        kernel,
        out_shape=jax.ShapeDtypeStruct((P, HW), img.dtype),
        grid_spec=pltpu.PrefetchScalarGridSpec(
            num_scalar_prefetch=1,
            grid=grid,
            in_specs=[pl.BlockSpec((tp, HW), lambda p, dy_ref: (p, 0))],
            out_specs=pl.BlockSpec((tp, HW), lambda p, dy_ref: (p, 0)),
        ),
        compiler_params=pltpu.CompilerParams(
            # Embarrassingly parallel over plane blocks; lets Mosaic shard the
            # grid across the 2 TensorCores on v7x (no-op on v5e/v6e).
            dimension_semantics=("parallel",),
            vmem_limit_bytes=vmem_limit,
        ),
        cost_estimate=pl.CostEstimate(
            flops=0,
            transcendentals=0,
            bytes_accessed=2 * P * HW * itemsize,   # read + write, zero FLOPs
        ),
    )(dy_arr, x)
    return out.reshape(N, C, H, W)


class TranslateDownPallas:
    """JAX/Pallas equivalent of the PyTorch TranslateDown module."""

    def __init__(self, pixels=20):
        self.pixels = pixels

    def __call__(self, img, key):
        # random.choice(torch.arange(pixels)) -> uniform int in [0, pixels),
        # drawn on device (no int()/host sync; whole call stays jittable).
        dy = jax.random.randint(key, (), 0, self.pixels, dtype=jnp.int32)
        return translate_down(img, dy)
        # TODO(synk): torchvision affine with non-integer translation would
        # bilinearly interpolate; only integer dy (what arange(pixels) yields)
        # is implemented here.


def _reference(img, dy):
    N, C, H, W = img.shape
    ref = jnp.zeros_like(img)
    if dy < H:
        ref = ref.at[:, :, dy:, :].set(img[:, :, : H - dy, :])
    return ref


if __name__ == "__main__":
    key = jax.random.PRNGKey(0)
    k_img, k_dy = jax.random.split(key)

    # Small, module-consistent shapes: batch=2, channels=4, spatial=16 (NCHW).
    N, C, H, W = 2, 4, 16, 16
    img = jax.random.normal(k_img, (N, C, H, W), dtype=jnp.float32)

    # 1) Module path (dy < H).
    module = TranslateDownPallas(pixels=8)
    out = jax.block_until_ready(module(img, k_dy))
    dy = int(jax.random.randint(k_dy, (), 0, module.pixels, dtype=jnp.int32))
    ref = _reference(img, dy)
    assert out.shape == img.shape and out.dtype == img.dtype
    assert jnp.array_equal(out, ref), "mismatch vs reference (dy < H)"

    # 2) dy >= H path: output must be all zeros (mask uses un-wrapped shift).
    out_big = jax.block_until_ready(translate_down(img, H + 3))
    assert jnp.array_equal(out_big, jnp.zeros_like(img)), "dy >= H should zero out"

    # 3) Packed dtype (bf16) smoke test on the same shape.
    img_bf16 = img.astype(jnp.bfloat16)
    out_bf16 = jax.block_until_ready(translate_down(img_bf16, 3))
    assert jnp.array_equal(out_bf16, _reference(img_bf16, 3)), "bf16 mismatch"

    print("KERNEL_OK")
</pallas_src>

<mosaic_0001>
module attributes {stable_mosaic.version = 11 : i64} {
  func.func @_translate_down_kernel(%arg0: i32, %arg1: memref<1xi32, #tpu.memory_space<smem>>, %arg2: memref<8x256xf32, #tpu.memory_space<vmem>>, %arg3: memref<8x256xf32, #tpu.memory_space<vmem>>) attributes {dimension_semantics = [#tpu.dimension_semantics<parallel>], iteration_bounds = array<i64: 1>, scalar_prefetch = 1 : i64, scratch_operands = 0 : i64, tpu.core_type = #tpu.core_type<tc>, window_params = [{transform_indices = @transform_0, window_bounds = array<i64: 8, 256>}, {transform_indices = @transform_1, window_bounds = array<i64: 8, 256>}]} {
    %c0 = arith.constant 0 : index
    %0 = memref.load %arg1[%c0] : memref<1xi32, #tpu.memory_space<smem>>
    %c16_i32 = arith.constant 16 : i32
    %1 = arith.muli %0, %c16_i32 : i32
    %c0_0 = arith.constant 0 : index
    %c0_1 = arith.constant 0 : index
    %2 = vector.load %arg2[%c0_0, %c0_1] : memref<8x256xf32, #tpu.memory_space<vmem>>, vector<8x256xf32>
    %c256_i32 = arith.constant 256 : i32
    %c0_i32 = arith.constant 0 : i32
    %3 = arith.cmpi eq, %c256_i32, %c0_i32 : i32
    %c1_i32 = arith.constant 1 : i32
    %4 = arith.select %3, %c1_i32, %c256_i32 : i32
    %5 = arith.remsi %1, %4 : i32
    %c0_i32_2 = arith.constant 0 : i32
    %6 = arith.cmpi ne, %5, %c0_i32_2 : i32
    %c0_i32_3 = arith.constant 0 : i32
    %7 = arith.cmpi slt, %5, %c0_i32_3 : i32
    %c0_i32_4 = arith.constant 0 : i32
    %8 = arith.cmpi slt, %4, %c0_i32_4 : i32
    %9 = arith.xori %7, %8 : i1
    %10 = arith.andi %9, %6 : i1
    %11 = arith.addi %5, %4 : i32
    %12 = arith.select %10, %11, %5 : i32
    %13 = tpu.dynamic_rotate %2 by %12 dim 1 : vector<8x256xf32>, i32 -> vector<8x256xf32>
    %14 = tpu.iota {dimensions = array<i32: 1>} : vector<1x256xi32>
    %15 = vector.broadcast %1 : i32 to vector<1x256xi32>
    %16 = arith.cmpi sge, %14, %15 : vector<1x256xi32>
    %cst = arith.constant 0.000000e+00 : f32
    %17 = vector.shape_cast %16 : vector<1x256xi1> to vector<1x256xi1>
    %18 = vector.broadcast %17 : vector<1x256xi1> to vector<8x256xi1>
    %19 = vector.broadcast %cst : f32 to vector<8x256xf32>
    %20 = arith.select %18, %13, %19 : vector<8x256xi1>, vector<8x256xf32>
    %c0_5 = arith.constant 0 : index
    %c0_6 = arith.constant 0 : index
    %21 = vector.load %arg3[%c0_5, %c0_6] : memref<8x256xf32, #tpu.memory_space<vmem>>, vector<8x256xf32>
    tpu.vector_store %arg3[%c0_5, %c0_6], %20 {strides = array<i32>} : memref<8x256xf32, #tpu.memory_space<vmem>>, vector<8x256xf32>,
    return
  }
  func.func @transform_0(%arg0: i32, %arg1: memref<1xi32, #tpu.memory_space<smem>>) -> (i32, i32) {
    %c0_i32 = arith.constant 0 : i32
    %c0_i32_0 = arith.constant 0 : i32
    return %arg0, %c0_i32 : i32, i32
  }
  func.func @transform_1(%arg0: i32, %arg1: memref<1xi32, #tpu.memory_space<smem>>) -> (i32, i32) {
    %c0_i32 = arith.constant 0 : i32
    %c0_i32_0 = arith.constant 0 : i32
    return %arg0, %c0_i32 : i32, i32
  }
}

</mosaic_0001>

<bundles_post_ra>
// kernel: tpu_custom_call.1
= control target key start
LH: loop header
LB: loop body
LE: loop exit
PB: predicated region body
PF: predicated region fallthrough
CT: control target
= control target key end

     0   :  { %8 = vsyncpa [#allocation5], 0  ;;  %s172_s0 = inlined_call_operand.<no memory space> [shape: s32[1], index: 0, kind: input, shape index: {}]   ;;  %s173_s1 = inlined_call_operand.hbm [shape: f32[8,256], index: 1, kind: input, shape index: {}]   ;;  %s174_s2 = inlined_call_operand.hbm [shape: f32[8,256], index: 2, kind: output, shape index: {}]  }
   0x1   :  { %9 = vsyncpa [#allocation6], 0  ;;  %s15_s11 = sshll.u32 %s173_s1, 4  ;;  %s146_s12 = smov [#allocation4]   ;;  %s16_s11 = int_to_ptr.hbm [resolvable:$true] %s15_s11 }
   0x2   :  { %s17_s13 = sshll.u32 %s146_s12, 4  ;;  %s18_s13 = int_to_ptr.vmem [resolvable:$true] %s17_s13 }
   0x3   :  { %20 = dma.hbm_to_vmem [thread:$0]  %s16_s11, 256, %s18_s13, [#allocation5]  }
   0x4   :  { %142 = dma.done.wait [#allocation5], 256  }
   0x5   :  { %143 = vsyncadd [#allocation5], 4294967040  ;;  %s88_s16 = sshll.u32 %s172_s0, 4  ;;  %v27_v0 = vld [vmem:[#allocation4] sm:$0xff]  ;;  %v28_v1 = vld [vmem:[#allocation4 + $0x8] sm:$0xff]  ;;  %v49_v2 = vlaneseq  ;;  %s147_s24 = smov [#allocation7]  }
   0x6   :  { %p29_p0 = scmp.lt.s32.totalorder %s88_s16, 0  ;;  %s30_s17 = ssub.s32 0, %s88_s16  ;;  %v60_v8 = vstv %s88_s16 }
   0x7   :  { %s89_s18 = smin.u32 %s88_s16, %s30_s17  ;;  %v50_v4 = vand.u32 127, %v49_v2  ;;  %s76_s25 = sshll.u32 %s147_s24, 4  ;;  %s77_s25 = int_to_ptr.vmem [resolvable:$true] %s76_s25 }
   0x8   :  { %s32_s19 = sand.u32 255, %s89_s18   ;;  %s78_s28 = sshll.u32 %s174_s2, 4  ;;  %s79_s28 = int_to_ptr.hbm [resolvable:$true] %s78_s28 }
   0x9   :  { %s33_s20 = ssub.s32 0, %s32_s19  ;;  %v59_v7 = vadd.s32 128, %v50_v4  ;;  %vm61_vm2 = vcmp.ge.s32.totalorder %v50_v4, %v60_v8 }
   0xa   :  { %s176_s20 = smov (!%p29_p0, %s33_s20), %s32_s19 }
   0xb   :  { %p91_p1 = scmp.lt.s32.totalorder %s176_s20, 0  ;;  %s39_s21 = sadd.s32 256, %s176_s20  ;;  %vm62_vm3 = vcmp.ge.s32.totalorder %v59_v7, %v60_v8 }
   0xd   :  { %s178_s21 = smov (!%p91_p1, %s39_s21), %s176_s20 }
   0xe   :  { %s41_s1 = sand.u32 255, %s178_s21  }
   0xf   :  { %s42_s22 = sand.u32 127, %s41_s1   ;;  %s43_s23 = sshrl.u32 %s41_s1, 7 }
  0x10   :  { %44 = vrot.lane.b32.xlu0 %v27_v0, %s42_s22  ;;  %s54_s0 = sand.u32 1, %s43_s23  ;;  %v48_v5 = vstv %s42_s22 }
  0x11   :  { %v55_v6 = vstv %s54_s0  ;;  %vm51_vm0 = vcmp.lt.s32.totalorder %v50_v4, %v48_v5 }
  0x12   :  { %vm56_vm1 = vcmp.ne.s32.totalorder %v55_v6, 0 }
  0x18   :  { %46 = vrot.lane.b32.xlu0 %v28_v1, %s42_s22 }
  0x82   :  { %v45_v3 = vpop.permute.xlu0 %44 }
  0x8a   :  { %v47_v9 = vpop.permute.xlu0 %46 }
  0x8b   :  { %v52_v10 = vsel %vm51_vm0, %v45_v3, %v47_v9  ;;  %v53_v11 = vsel %vm51_vm0, %v47_v9, %v45_v3 }
  0x8c   :  { %v57_v12 = vsel %vm56_vm1, %v52_v10, %v53_v11  ;;  %v58_v13 = vsel %vm56_vm1, %v53_v11, %v52_v10 }
  0x8d   :  { %v67_v14 = vsel %vm61_vm2, %v57_v12, 0.0  ;;  %v68_v15 = vsel %vm62_vm3, %v58_v13, 0.0 }
  0x8e   :  { %69 = vst [vmem:[#allocation7] sm:$0xff] %v67_v14 }
  0x8f   :  { %70 = vst [vmem:[#allocation7 + $0x8] sm:$0xff] %v68_v15 }
  0x90   :  { %81 = dma.vmem_to_hbm [thread:$0]  %s77_s25, 256, %s79_s28, [#allocation6]  }
  0x91   :  { %144 = dma.done.wait [#allocation6], 256  }
  0x92   :  { %145 = vsyncadd [#allocation6], 4294967040 }
  0x93   :  { %86 = vsyncpa [#allocation5], 1 }
  0x94   :  { %87 = vsyncpa [#allocation6], 1 }

</bundles_post_ra>
